<compile_context>
chip_gen: v7x
topology: tpu7x:2x2x1
jax: 0.10.0
libtpu: 0.0.40
codegen_flags: <defaults>
</compile_context>

<pallas_src>
import jax
import jax.numpy as jnp
from jax.experimental import pallas as pl
from jax.experimental.pallas import tpu as pltpu


def fusion_kernel(x_ref, w_ref, ss_ref, out_ref):
    oc = ss_ref.shape[-1]

    x = x_ref[...]                                       # f32 (bt, F): [f1|f2|f3]

    # Single block-diagonal (gate|input)x3 matmul -> (bt, 6*oc), f32 accumulation.
    r = jnp.dot(x.astype(jnp.bfloat16), w_ref[...],
                preferred_element_type=jnp.float32)

    # Gates: sigmoid(Linear(x)) -- Linear bias is 0 per module init.
    g1 = jax.nn.sigmoid(r[:, 0 * oc:1 * oc])
    g2 = jax.nn.sigmoid(r[:, 2 * oc:3 * oc])
    g3 = jax.nn.sigmoid(r[:, 4 * oc:5 * oc])

    # Inputs: BatchNorm1d(Linear(x)) folded into per-channel scale/shift.
    # ss_ref rows: 0=s1, 1=sh1, 2=s2, 3=sh2, 4=s3, 5=sh3 (rows 6,7 padding).
    i1 = r[:, 1 * oc:2 * oc] * ss_ref[0:1, :] + ss_ref[1:2, :]
    i2 = r[:, 3 * oc:4 * oc] * ss_ref[2:3, :] + ss_ref[3:4, :]
    i3 = r[:, 5 * oc:6 * oc] * ss_ref[4:5, :] + ss_ref[5:6, :]

    fused = g1 * i1 + g2 * i2 + g3 * i3
    denom = g1 + g2 + g3                                  # sum of sigmoids, > 0
    y = fused * pl.reciprocal(denom, approx=True)

    # Emit the full concatenated output row in one full-block store
    # (feats region is < 128 lanes wide -> masked stores there only).
    out_ref[...] = jnp.concatenate([x, y], axis=-1)


def _pick_bt(B):
    """Batch tile: whole batch for small B, otherwise >=2 blocks, tile <= 1024."""
    if B <= 256:
        return B
    bt = -(-B // 2)                 # cdiv(B, 2): at least 2 blocks for v7x megacore
    bt = ((bt + 7) // 8) * 8        # sublane multiple
    return min(bt, 1024)            # reviewed sweet spot 512-1024; VMEM ~2.4 MiB


def fusion_module_c_forward(feats1, feats2, feats3, params):
    """Returns concat([feats1, feats2, feats3, gated_fused], axis=1)."""
    B = feats1.shape[0]
    out_ch = params["ss"].shape[1]

    # One lane-merged input stream (single DMA per grid step instead of 3).
    # TODO(synk): for very large B this host concat could be removed again by
    # keeping three input refs and concatenating in VMEM inside the kernel.
    x = jnp.concatenate([feats1, feats2, feats3], axis=1)
    ft = x.shape[1]

    bt = _pick_bt(B)
    grid = (pl.cdiv(B, bt),)

    out = pl.pallas_call(
        fusion_kernel,
        out_shape=jax.ShapeDtypeStruct((B, ft + out_ch), jnp.float32),
        grid=grid,
        in_specs=[
            pl.BlockSpec((bt, ft), lambda i: (i, 0)),               # feats tile
            pl.BlockSpec((ft, 6 * out_ch), lambda i: (0, 0)),       # resident weight
            pl.BlockSpec((8, out_ch), lambda i: (0, 0)),            # resident BN scale/shift
        ],
        out_specs=pl.BlockSpec((bt, ft + out_ch), lambda i: (i, 0)),
        compiler_params=pltpu.CompilerParams(
            dimension_semantics=("parallel",),
        ),
    )(x, params["w"], params["ss"])
    return out


def make_params(key, in_img, in_nonimg, out_ch):
    """Build kernel params: block-diagonal bf16 weight + stacked BN scale/shift."""
    ks = jax.random.split(key, 18)
    scale_w = 0.05
    eps = 1e-5

    # Gate / input linears, (in, out), bias = 0 per nn.init.constant_(bias, 0).
    wg = [
        scale_w * jax.random.normal(ks[0], (in_img, out_ch), jnp.float32),
        scale_w * jax.random.normal(ks[1], (in_img, out_ch), jnp.float32),
        scale_w * jax.random.normal(ks[2], (in_nonimg, out_ch), jnp.float32),
    ]
    wi = [
        scale_w * jax.random.normal(ks[3], (in_img, out_ch), jnp.float32),
        scale_w * jax.random.normal(ks[4], (in_img, out_ch), jnp.float32),
        scale_w * jax.random.normal(ks[5], (in_nonimg, out_ch), jnp.float32),
    ]

    # BatchNorm1d (inference mode): fold gamma/beta/running stats into scale/shift.
    # TODO(synk): training-mode BatchNorm (batch statistics) not implemented; eval-mode used.
    scales, shifts = [], []
    for b in range(3):
        kg, kb, km, kv = ks[6 + 4 * b: 10 + 4 * b]
        gamma = 1.0 + 0.1 * jax.random.normal(kg, (out_ch,), jnp.float32)
        beta = 0.1 * jax.random.normal(kb, (out_ch,), jnp.float32)
        rmean = 0.1 * jax.random.normal(km, (out_ch,), jnp.float32)
        rvar = jnp.abs(1.0 + 0.1 * jax.random.normal(kv, (out_ch,), jnp.float32))
        scale = gamma / jnp.sqrt(rvar + eps)
        shift = beta - rmean * scale
        scales.append(scale)
        shifts.append(shift)

    # Block-diagonal fused weight: rows follow the [f1|f2|f3] input layout,
    # columns are [g1 | i1 | g2 | i2 | g3 | i3], each out_ch wide.
    ft = 2 * in_img + in_nonimg
    row_off = [0, in_img, 2 * in_img]
    row_len = [in_img, in_img, in_nonimg]
    W = jnp.zeros((ft, 6 * out_ch), jnp.float32)
    for n in range(3):
        r0, rl = row_off[n], row_len[n]
        W = W.at[r0:r0 + rl, (2 * n) * out_ch:(2 * n + 1) * out_ch].set(wg[n])
        W = W.at[r0:r0 + rl, (2 * n + 1) * out_ch:(2 * n + 2) * out_ch].set(wi[n])

    p = {"w": W.astype(jnp.bfloat16)}
    # Stacked scale/shift: rows s1, sh1, s2, sh2, s3, sh3, pad, pad -> (8, out_ch).
    ss = jnp.stack(
        [scales[0], shifts[0], scales[1], shifts[1], scales[2], shifts[2]], axis=0)
    p["ss"] = jnp.concatenate([ss, jnp.zeros((2, out_ch), jnp.float32)], axis=0)
    # f32 copies kept for the pure-JAX reference check.
    p["_ref"] = {"wg": wg, "wi": wi, "s": scales, "sh": shifts}
    return p


if __name__ == "__main__":
    B = 8
    in_channels_img = 32
    in_channels_nonimg = 16
    out_channels = 128

    key = jax.random.PRNGKey(0)
    k1, k2, k3, kp = jax.random.split(key, 4)
    feats1 = jax.random.normal(k1, (B, in_channels_img), jnp.float32)
    feats2 = jax.random.normal(k2, (B, in_channels_img), jnp.float32)
    feats3 = jax.random.normal(k3, (B, in_channels_nonimg), jnp.float32)

    params = make_params(kp, in_channels_img, in_channels_nonimg, out_channels)

    out = fusion_module_c_forward(feats1, feats2, feats3, params)
    jax.block_until_ready(out)

    expected_cols = 2 * in_channels_img + in_channels_nonimg + out_channels
    assert out.shape == (B, expected_cols), out.shape

    # Pure-JAX f32 reference (matches the PyTorch module in eval mode).
    def ref(f1, f2, f3, rp):
        sig = jax.nn.sigmoid
        g1 = sig(f1 @ rp["wg"][0]); g2 = sig(f2 @ rp["wg"][1]); g3 = sig(f3 @ rp["wg"][2])
        i1 = (f1 @ rp["wi"][0]) * rp["s"][0] + rp["sh"][0]
        i2 = (f2 @ rp["wi"][1]) * rp["s"][1] + rp["sh"][1]
        i3 = (f3 @ rp["wi"][2]) * rp["s"][2] + rp["sh"][2]
        fused = g1 * i1 + g2 * i2 + g3 * i3
        return jnp.concatenate([f1, f2, f3, fused / (g1 + g2 + g3)], axis=1)

    ref_out = ref(feats1, feats2, feats3, params["_ref"])
    # Tolerance loosened for bf16 matmul operands + approx reciprocal.
    assert jnp.allclose(out, ref_out, atol=2e-2, rtol=2e-2), (
        float(jnp.max(jnp.abs(out - ref_out))))

    print("KERNEL_OK")
</pallas_src>

<mosaic_0001>
module attributes {stable_mosaic.version = 11 : i64} {
  func.func @fusion_kernel(%arg0: i32, %arg1: memref<8x80xf32, #tpu.memory_space<vmem>>, %arg2: memref<80x768xbf16, #tpu.memory_space<vmem>>, %arg3: memref<8x128xf32, #tpu.memory_space<vmem>>, %arg4: memref<8x208xf32, #tpu.memory_space<vmem>>) attributes {dimension_semantics = [#tpu.dimension_semantics<parallel>], iteration_bounds = array<i64: 1>, scalar_prefetch = 0 : i64, scratch_operands = 0 : i64, tpu.core_type = #tpu.core_type<tc>, window_params = [{transform_indices = @transform_0, window_bounds = array<i64: 8, 80>}, {pipeline_mode = #tpu.pipeline_mode<synchronous>, transform_indices = @transform_1, window_bounds = array<i64: 80, 768>}, {pipeline_mode = #tpu.pipeline_mode<synchronous>, transform_indices = @transform_2, window_bounds = array<i64: 8, 128>}, {transform_indices = @transform_3, window_bounds = array<i64: 8, 208>}]} {
    %c0 = arith.constant 0 : index
    %c0_0 = arith.constant 0 : index
    %0 = vector.load %arg1[%c0, %c0_0] : memref<8x80xf32, #tpu.memory_space<vmem>>, vector<8x80xf32>
    %1 = arith.truncf %0 : vector<8x80xf32> to vector<8x80xbf16>
    %c0_1 = arith.constant 0 : index
    %c0_2 = arith.constant 0 : index
    %2 = vector.load %arg2[%c0_1, %c0_2] : memref<80x768xbf16, #tpu.memory_space<vmem>>, vector<80x768xbf16>
    %cst = arith.constant dense<0.000000e+00> : vector<8x768xf32>
    %3 = tpu.matmul %1, %2, %cst {dimension_numbers = #tpu.dot_dimension_numbers<[1], [0], [0], [1], [0, 0, 1, 1], [], []>} : vector<8x80xbf16>, vector<80x768xbf16>, vector<8x768xf32> -> vector<8x768xf32>
    %4 = vector.extract_strided_slice %3 {offsets = [0, 0], sizes = [8, 128], strides = [1, 1]} : vector<8x768xf32> to vector<8x128xf32>
    %5 = arith.negf %4 : vector<8x128xf32>
    %6 = math.exp %5 : vector<8x128xf32>
    %cst_3 = arith.constant 1.000000e+00 : f32
    %7 = vector.broadcast %cst_3 : f32 to vector<8x128xf32>
    %8 = arith.addf %7, %6 : vector<8x128xf32>
    %9 = arith.divf %7, %8 : vector<8x128xf32>
    %10 = vector.extract_strided_slice %3 {offsets = [0, 256], sizes = [8, 128], strides = [1, 1]} : vector<8x768xf32> to vector<8x128xf32>
    %11 = arith.negf %10 : vector<8x128xf32>
    %12 = math.exp %11 : vector<8x128xf32>
    %cst_4 = arith.constant 1.000000e+00 : f32
    %13 = vector.broadcast %cst_4 : f32 to vector<8x128xf32>
    %14 = arith.addf %13, %12 : vector<8x128xf32>
    %15 = arith.divf %13, %14 : vector<8x128xf32>
    %16 = vector.extract_strided_slice %3 {offsets = [0, 512], sizes = [8, 128], strides = [1, 1]} : vector<8x768xf32> to vector<8x128xf32>
    %17 = arith.negf %16 : vector<8x128xf32>
    %18 = math.exp %17 : vector<8x128xf32>
    %cst_5 = arith.constant 1.000000e+00 : f32
    %19 = vector.broadcast %cst_5 : f32 to vector<8x128xf32>
    %20 = arith.addf %19, %18 : vector<8x128xf32>
    %21 = arith.divf %19, %20 : vector<8x128xf32>
    %22 = vector.extract_strided_slice %3 {offsets = [0, 128], sizes = [8, 128], strides = [1, 1]} : vector<8x768xf32> to vector<8x128xf32>
    %c0_6 = arith.constant 0 : index
    %c0_7 = arith.constant 0 : index
    %23 = vector.load %arg3[%c0_6, %c0_7] : memref<8x128xf32, #tpu.memory_space<vmem>>, vector<1x128xf32>
    %24 = vector.broadcast %23 : vector<1x128xf32> to vector<8x128xf32>
    %25 = arith.mulf %22, %24 : vector<8x128xf32>
    %c1 = arith.constant 1 : index
    %c0_8 = arith.constant 0 : index
    %26 = vector.load %arg3[%c1, %c0_8] : memref<8x128xf32, #tpu.memory_space<vmem>>, vector<1x128xf32>
    %27 = vector.broadcast %26 : vector<1x128xf32> to vector<8x128xf32>
    %28 = arith.addf %25, %27 : vector<8x128xf32>
    %29 = vector.extract_strided_slice %3 {offsets = [0, 384], sizes = [8, 128], strides = [1, 1]} : vector<8x768xf32> to vector<8x128xf32>
    %c2 = arith.constant 2 : index
    %c0_9 = arith.constant 0 : index
    %30 = vector.load %arg3[%c2, %c0_9] : memref<8x128xf32, #tpu.memory_space<vmem>>, vector<1x128xf32>
    %31 = vector.broadcast %30 : vector<1x128xf32> to vector<8x128xf32>
    %32 = arith.mulf %29, %31 : vector<8x128xf32>
    %c3 = arith.constant 3 : index
    %c0_10 = arith.constant 0 : index
    %33 = vector.load %arg3[%c3, %c0_10] : memref<8x128xf32, #tpu.memory_space<vmem>>, vector<1x128xf32>
    %34 = vector.broadcast %33 : vector<1x128xf32> to vector<8x128xf32>
    %35 = arith.addf %32, %34 : vector<8x128xf32>
    %36 = vector.extract_strided_slice %3 {offsets = [0, 640], sizes = [8, 128], strides = [1, 1]} : vector<8x768xf32> to vector<8x128xf32>
    %c4 = arith.constant 4 : index
    %c0_11 = arith.constant 0 : index
    %37 = vector.load %arg3[%c4, %c0_11] : memref<8x128xf32, #tpu.memory_space<vmem>>, vector<1x128xf32>
    %38 = vector.broadcast %37 : vector<1x128xf32> to vector<8x128xf32>
    %39 = arith.mulf %36, %38 : vector<8x128xf32>
    %c5 = arith.constant 5 : index
    %c0_12 = arith.constant 0 : index
    %40 = vector.load %arg3[%c5, %c0_12] : memref<8x128xf32, #tpu.memory_space<vmem>>, vector<1x128xf32>
    %41 = vector.broadcast %40 : vector<1x128xf32> to vector<8x128xf32>
    %42 = arith.addf %39, %41 : vector<8x128xf32>
    %43 = arith.mulf %9, %28 : vector<8x128xf32>
    %44 = arith.mulf %15, %35 : vector<8x128xf32>
    %45 = arith.addf %43, %44 : vector<8x128xf32>
    %46 = arith.mulf %21, %42 : vector<8x128xf32>
    %47 = arith.addf %45, %46 : vector<8x128xf32>
    %48 = arith.addf %9, %15 : vector<8x128xf32>
    %49 = arith.addf %48, %21 : vector<8x128xf32>
    %50 = tpu.reciprocal %49 {approx = true} : vector<8x128xf32> -> vector<8x128xf32>
    %51 = arith.mulf %47, %50 : vector<8x128xf32>
    %52 = tpu.concatenate %0, %51 in 1 : vector<8x80xf32>, vector<8x128xf32> -> vector<8x208xf32>
    %c0_13 = arith.constant 0 : index
    %c0_14 = arith.constant 0 : index
    %53 = vector.load %arg4[%c0_13, %c0_14] : memref<8x208xf32, #tpu.memory_space<vmem>>, vector<8x208xf32>
    tpu.vector_store %arg4[%c0_13, %c0_14], %52 {strides = array<i32>} : memref<8x208xf32, #tpu.memory_space<vmem>>, vector<8x208xf32>,
    return
  }
  func.func @transform_0(%arg0: i32) -> (i32, i32) {
    %c0_i32 = arith.constant 0 : i32
    %c0_i32_0 = arith.constant 0 : i32
    return %arg0, %c0_i32 : i32, i32
  }
  func.func @transform_1(%arg0: i32) -> (i32, i32) {
    %c0_i32 = arith.constant 0 : i32
    %c0_i32_0 = arith.constant 0 : i32
    %c0_i32_1 = arith.constant 0 : i32
    return %c0_i32, %c0_i32_0 : i32, i32
  }
  func.func @transform_2(%arg0: i32) -> (i32, i32) {
    %c0_i32 = arith.constant 0 : i32
    %c0_i32_0 = arith.constant 0 : i32
    %c0_i32_1 = arith.constant 0 : i32
    return %c0_i32, %c0_i32_0 : i32, i32
  }
  func.func @transform_3(%arg0: i32) -> (i32, i32) {
    %c0_i32 = arith.constant 0 : i32
    %c0_i32_0 = arith.constant 0 : i32
    return %arg0, %c0_i32 : i32, i32
  }
}

</mosaic_0001>

<bundles_post_ra>
// kernel: tpu_custom_call.1
= control target key start
LH: loop header
LB: loop body
LE: loop exit
PB: predicated region body
PF: predicated region fallthrough
CT: control target
= control target key end

     0   :  { %8 = vsyncpa [#allocation3], 0  ;;  %s737_s0 = inlined_call_operand.hbm [shape: f32[8,80], index: 0, kind: input, shape index: {}]   ;;  %s738_s1 = inlined_call_operand.hbm [shape: bf16[80,768], index: 1, kind: input, shape index: {}]   ;;  %s739_s2 = inlined_call_operand.hbm [shape: f32[8,128], index: 2, kind: input, shape index: {}]   ;;  %s740_s3 = inlined_call_operand.hbm [shape: f32[8,208], index: 3, kind: output, shape index: {}]  }
   0x1   :  { %9 = vsyncpa [#allocation6], 0 }
   0x2   :  { %10 = vsyncpa [#allocation4], 0  ;;  %s651_s12 = smov [#allocation5]   ;;  %s557_s16 = scalar_lea.hbm %s738_s1, 3840 }
   0x3   :  { %s26_s13 = sshll.u32 %s651_s12, 4  ;;  %p558_p0 = scmp.ne.s32.totalorder %s738_s1, %s557_s16  ;;  %s27_s13 = int_to_ptr.vmem [resolvable:$true] %s26_s13 }
   0x4   :  { %p561_p1 = scmp.lt.u32.totalorder %s557_s16, %s738_s1 }
   0x6   :  { %p563_p2 = pnand %p561_p1, %p558_p0 }
   0x8   :  { %566 = shalt.err (!%p563_p2)
}
   0x9   :  { %s567_s21 = scalar_lea.vmem %s27_s13, 3840  ;;  %p572_p4 = scmp.lt.s32.totalorder %s27_s13, %s27_s13 }
   0xa   :  { %p568_p3 = scmp.ne.s32.totalorder %s27_s13, %s567_s21  ;;  %p573_p5 = scmp.lt.s32.totalorder %s567_s21, %s567_s21 }
   0xc   :  { %p574_p6 = por %p573_p5, %p572_p4 }
   0xe   :  { %p575_p7 = pnand %p574_p6, %p568_p3 }
  0x10   :  { %578 = shalt.err (!%p575_p7)
}
  0x11   :  { %s652_s22 = smov 384   ;;  %s653_s23 = smov 24  }
  0x12   :  { %32 = dma.hbm_to_vmem [thread:$0]  %s738_s1, 3840, %s27_s13, [#allocation6], %s652_s22, %s652_s22, %s653_s23  }
  0x13   :  { %s654_s26 = smov [#allocation2]   ;;  %s655_s28 = smov [#allocation7]  }
  0x14   :  { %s17_s27 = sshll.u32 %s654_s26, 4  ;;  %s39_s29 = sshll.u32 %s655_s28, 4  ;;  %s18_s27 = int_to_ptr.vmem [resolvable:$true] %s17_s27  ;;  %s40_s29 = int_to_ptr.vmem [resolvable:$true] %s39_s29 }
  0x15   :  { %s579_s5 = scalar_lea.hbm %s737_s0, 128 }
  0x16   :  { %p580_p8 = scmp.ne.s32.totalorder %s737_s0, %s579_s5  ;;  %p583_p9 = scmp.lt.u32.totalorder %s579_s5, %s737_s0 }
  0x18   :  { %p585_p10 = pnand %p583_p9, %p580_p8 }
  0x1a   :  { %588 = shalt.err (!%p585_p10)
}
  0x1b   :  { %s589_s1 = scalar_lea.vmem %s18_s27, 128  ;;  %p594_p12 = scmp.lt.s32.totalorder %s18_s27, %s18_s27 }
  0x1c   :  { %p590_p11 = scmp.ne.s32.totalorder %s18_s27, %s589_s1  ;;  %p595_p13 = scmp.lt.s32.totalorder %s589_s1, %s589_s1 }
  0x1e   :  { %p596_p0 = por %p595_p13, %p594_p12 }
  0x20   :  { %p597_p1 = pnand %p596_p0, %p590_p11 }
  0x22   :  { %600 = shalt.err (!%p597_p1)
}
  0x23   :  { %20 = dma.hbm_to_vmem [thread:$0]  %s737_s0, 128, %s18_s27, [#allocation3]  }
  0x24   :  { %s601_s14 = scalar_lea.hbm %s739_s2, 128 }
  0x25   :  { %p602_p2 = scmp.ne.s32.totalorder %s739_s2, %s601_s14  ;;  %p605_p3 = scmp.lt.u32.totalorder %s601_s14, %s739_s2 }
  0x27   :  { %p607_p4 = pnand %p605_p3, %p602_p2 }
  0x29   :  { %610 = shalt.err (!%p607_p4)
}
  0x2a   :  { %s611_s19 = scalar_lea.vmem %s40_s29, 128  ;;  %p616_p6 = scmp.lt.s32.totalorder %s40_s29, %s40_s29 }
  0x2b   :  { %p612_p5 = scmp.ne.s32.totalorder %s40_s29, %s611_s19  ;;  %p617_p7 = scmp.lt.s32.totalorder %s611_s19, %s611_s19 }
  0x2d   :  { %p618_p8 = por %p617_p7, %p616_p6 }
  0x2f   :  { %p619_p9 = pnand %p618_p8, %p612_p5 }
  0x31   :  { %622 = shalt.err (!%p619_p9)
}
  0x32   :  { %42 = dma.hbm_to_vmem [thread:$0]  %s739_s2, 128, %s40_s29, [#allocation6]  }
  0x33   :  { %645 = dma.done.wait [#allocation3], 128  }
  0x34   :  { %646 = vsyncadd [#allocation3], 4294967168 }
  0x35   :  { %647 = dma.done.wait [#allocation6], 3968  }
  0x36   :  { %648 = vsyncadd [#allocation6], 4294963328  ;;  %v656_v0 = vmov 0   ;;  %v498_v1 = vld [vmem:[#allocation5 + $0x4] ss:$24 sps:$4 sm:$0xff]   ;;  %vm235_vm0 = vcmask 654336  }
  0x37   :  { %271 = vmatprep.mubr.bf16.mxu0 %v656_v0  ;;  %312 = vmatprep.mubr.bf16.mxu1 %v656_v0  ;;  %v500_v2 = vld [vmem:[#allocation5 + $0xc] ss:$24 sps:$4 sm:$0xff]   ;;  %v502_v3 = vld [vmem:[#allocation5] ss:$24 sps:$4 sm:$0xff]   ;;  %v506_v6 = vld [vmem:[#allocation5 + $0x3c] ss:$24 sps:$4 sm:$0xff]  }
  0x38   :  { %239 = vmatprep.subr.bf16.mxu0 %v498_v1  ;;  %v503_v4 = vld [vmem:[#allocation5 + $0x8] ss:$24 sps:$4 sm:$0xff]   ;;  %280 = vmatprep.subr.bf16.mxu1 %v500_v2  ;;  %v504_v5 = vld [vmem:[#allocation5 + $0x34] ss:$24 sps:$4 sm:$0xff]   ;;  %v509_v8 = vld [vmem:[#allocation5 + $0x38] ss:$24 sps:$4 sm:$0xff]  }
  0x39   :  { %240 = vmatpush1.bf16.msra.mxu0 %v502_v3  ;;  %281 = vmatpush1.bf16.msra.mxu1 %v503_v4  ;;  %v508_v7 = vld [vmem:[#allocation5 + $0x30] ss:$24 sps:$4 sm:$0xff]   ;;  %v510_v9 = vld [vmem:[#allocation5 + $0x64] ss:$24 sps:$4 sm:$0xff]   ;;  %v514_v11 = vld [vmem:[#allocation5 + $0x60] ss:$24 sps:$4 sm:$0xff]  }
  0x3a   :  { %241 = vmatprep.subr.bf16.mxu0 %v504_v5  ;;  %282 = vmatprep.subr.bf16.mxu1 %v506_v6  ;;  %v512_v10 = vld [vmem:[#allocation5 + $0x6c] ss:$24 sps:$4 sm:$0xff]   ;;  %v515_v12 = vld [vmem:[#allocation5 + $0x68] ss:$24 sps:$4 sm:$0xff]   ;;  %v518_v14 = vld [vmem:[#allocation5 + $0x9c] ss:$24 sps:$4 sm:$0xff]  }
  0x3b   :  { %v516_v13 = vld [vmem:[#allocation5 + $0x94] ss:$24 sps:$4 sm:$0xff]   ;;  %v520_v15 = vld [vmem:[#allocation5 + $0x90] ss:$24 sps:$4 sm:$0xff]   ;;  %v522_v17 = vld [vmem:[#allocation5 + $0xc4] ss:$24 sps:$4 sm:$0xff]  }
  0x3c   :  { %v521_v16 = vld [vmem:[#allocation5 + $0x98] ss:$24 sps:$4 sm:$0xff]   ;;  %v524_v18 = vld [vmem:[#allocation5 + $0xcc] ss:$24 sps:$4 sm:$0xff]   ;;  %v527_v20 = vld [vmem:[#allocation5 + $0xc8] ss:$24 sps:$4 sm:$0xff]  }
  0x3d   :  { %242 = vmatpush1.bf16.msra.mxu0 %v508_v7  ;;  %283 = vmatpush1.bf16.msra.mxu1 %v509_v8  ;;  %v526_v19 = vld [vmem:[#allocation5 + $0xc0] ss:$24 sps:$4 sm:$0xff]   ;;  %v530_v22 = vld [vmem:[#allocation5 + $0x14] ss:$24 sps:$4 sm:$0xff]   ;;  %v528_v24 = vld [vmem:[#allocation5 + $0x10] ss:$24 sps:$4 sm:$0xff]  }
  0x3e   :  { %243 = vmatprep.subr.bf16.mxu0 %v510_v9  ;;  %284 = vmatprep.subr.bf16.mxu1 %v512_v10  ;;  %v715_v21 = vld [vmem:[#allocation2] sm:$0xff]  ;;  %v536_v27 = vld [vmem:[#allocation5 + $0x74] ss:$24 sps:$4 sm:$0xff]   ;;  %v534_v28 = vld [vmem:[#allocation5 + $0x70] ss:$24 sps:$4 sm:$0xff]   ;;  %s657_s2 = smov 80  }
  0x3f   :  { %v54_v23 = vpack.c.bf16 %v715_v21, %v715_v21  ;;  %v533_v25 = vld [vmem:[#allocation5 + $0x44] ss:$24 sps:$4 sm:$0xff]   ;;  %v531_v26 = vld [vmem:[#allocation5 + $0x40] ss:$24 sps:$4 sm:$0xff]   ;;  %v542_v31 = vld [vmem:[#allocation5 + $0xd4] ss:$24 sps:$4 sm:$0xff]  }
  0x40   :  { %v539_v29 = vld [vmem:[#allocation5 + $0xa4] ss:$24 sps:$4 sm:$0xff]   ;;  %v537_v30 = vld [vmem:[#allocation5 + $0xa0] ss:$24 sps:$4 sm:$0xff]   ;;  %v540_v32 = vld [vmem:[#allocation5 + $0xd0] ss:$24 sps:$4 sm:$0xff]  }
  0x41   :  { %244 = vmatpush1.bf16.msra.mxu0 %v514_v11  ;;  %285 = vmatpush1.bf16.msra.mxu1 %v515_v12  ;;  %v484_v47 = vld [vmem:[#allocation7] ss:$0 sm:$0xff]  ;;  %v486_v48 = vld [vmem:[#allocation7 + $0x2] ss:$0 sm:$0xff]  ;;  %v485_v53 = vld [vmem:[#allocation7 + $0x1] ss:$0 sm:$0xff] }
  0x42   :  { %245 = vmatprep.subr.bf16.mxu0 %v516_v13  ;;  %286 = vmatprep.subr.bf16.mxu1 %v518_v14  ;;  %v487_v56 = vld [vmem:[#allocation7 + $0x3] ss:$0 sm:$0xff]  ;;  %v488_v4 = vld [vmem:[#allocation7 + $0x4] ss:$0 sm:$0xff]  ;;  %v489_v6 = vld [vmem:[#allocation7 + $0x5] ss:$0 sm:$0xff] }
  0x43   :  { %s658_s21 = smov [#allocation8]  }
  0x44   :  { %s438_s22 = sshll.u32 %s658_s21, 4  ;;  %s439_s22 = int_to_ptr.vmem [resolvable:$true] %s438_s22 }
  0x45   :  { %246 = vmatpush1.bf16.msra.mxu0 %v520_v15  ;;  %287 = vmatpush1.bf16.msra.mxu1 %v521_v16  ;;  %s623_s23 = scalar_lea.vmem %s439_s22, 256  ;;  %p628_p11 = scmp.lt.s32.totalorder %s439_s22, %s439_s22 }
  0x46   :  { %247 = vmatprep.subr.bf16.mxu0 %v522_v17  ;;  %288 = vmatprep.subr.bf16.mxu1 %v524_v18  ;;  %p624_p10 = scmp.ne.s32.totalorder %s439_s22, %s623_s23  ;;  %p629_p12 = scmp.lt.s32.totalorder %s623_s23, %s623_s23 }
  0x48   :  { %p630_p13 = por %p629_p12, %p628_p11 }
  0x49   :  { %248 = vmatpush1.bf16.msra.mxu0 %v526_v19  ;;  %289 = vmatpush1.bf16.msra.mxu1 %v527_v20 }
  0x4a   :  { %321 = vmatprep.subr.bf16.mxu0 %v530_v22  ;;  %p631_p0 = pnand %p630_p13, %p624_p10 }
  0x4c   :  { %478 = vmatmul.mubr.msk.bf16.vlgmr.msra.gmra.mrb[0].mxu0 %vm235_vm0, %v54_v23  ;;  %479 = vmatmul.mubr.msk.bf16.vlgmr.msra.gmra.mrb[0].mxu1 %vm235_vm0, %v54_v23 }
  0x4d   :  { %322 = vmatpush1.bf16.msra.mxu0 %v528_v24  ;;  %353 = vmatprep.mubr.bf16.mxu0 %v656_v0 }
  0x4e   :  { %323 = vmatprep.subr.bf16.mxu0 %v533_v25 }
  0x51   :  { %324 = vmatpush1.bf16.msra.mxu0 %v531_v26 }
  0x52   :  { %325 = vmatprep.subr.bf16.mxu0 %v536_v27 }
  0x55   :  { %326 = vmatpush1.bf16.msra.mxu0 %v534_v28 }
  0x56   :  { %327 = vmatprep.subr.bf16.mxu0 %v539_v29 }
  0x59   :  { %328 = vmatpush1.bf16.msra.mxu0 %v537_v30 }
  0x5a   :  { %329 = vmatprep.subr.bf16.mxu0 %v542_v31 }
  0x5d   :  { %330 = vmatpush1.bf16.msra.mxu0 %v540_v32 }
  0x60   :  { %480 = vmatmul.mubr.msk.bf16.vlgmr.msra.gmra.mrb[4].mxu0 %vm235_vm0, %v54_v23 }
 0x11f   :  { %v273_v33 = vpop.f32.mrb[0].mxu0  ;;  %v314_v34 = vpop.f32.mrb[0].mxu1 }
 0x120   :  { %v481_v35 = vmul.f32 -1.442695, %v273_v33  ;;  %v482_v36 = vmul.f32 -1.442695, %v314_v34  ;;  %v275_v37 = vpop.f32.mrb[1].mxu0  ;;  %v316_v38 = vpop.f32.mrb[1].mxu1 }
 0x121   :  { %v277_v39 = vpop.f32.mrb[2].mxu0  ;;  %v318_v40 = vpop.f32.mrb[2].mxu1  ;;  %v385_v50 = vmul.f32 %v484_v47, %v275_v37  ;;  %v397_v54 = vmul.f32 %v486_v48, %v316_v38 }
 0x122   :  { %543 = vpow2.f32 %v481_v35  ;;  %v278_v41 = vpop.f32.mrb[3].mxu0  ;;  %v319_v42 = vpop.f32.mrb[3].mxu1 }
 0x123   :  { %545 = vpow2.f32 %v482_v36  ;;  %v391_v58 = vadd.f32 %v485_v53, %v385_v50  ;;  %v403_v60 = vadd.f32 %v487_v56, %v397_v54 }
 0x12c   :  { %v544_v43 = vpop.eup %543 }
 0x12d   :  { %v546_v44 = vpop.eup %545  ;;  %v365_v45 = vadd.f32 1.0, %v544_v43 }
 0x12e   :  { %v371_v46 = vadd.f32 1.0, %v546_v44 }
 0x12f   :  { %547 = vrcp.f32 %v365_v45 }
 0x130   :  { %549 = vrcp.f32 %v371_v46 }
 0x133   :  { %v355_v49 = vpop.f32.mrb[4].mxu0 }
 0x134   :  { %v483_v51 = vmul.f32 -1.442695, %v355_v49  ;;  %v357_v52 = vpop.f32.mrb[5].mxu0 }
 0x135   :  { %v359_v55 = vpop.f32.mrb[6].mxu0  ;;  %v409_v5 = vmul.f32 %v488_v4, %v357_v52 }
 0x136   :  { %551 = vpow2.f32 %v483_v51  ;;  %v360_v57 = vpop.f32.mrb[7].mxu0 }
 0x137   :  { %v415_v7 = vadd.f32 %v489_v6, %v409_v5 }
 0x139   :  { %v548_v59 = vpop.eup %547 }
 0x13a   :  { %v550_v61 = vpop.eup %549  ;;  %v416_v62 = vmul.f32 %v548_v59, %v391_v58 }
 0x13b   :  { %v417_v63 = vmul.f32 %v550_v61, %v403_v60  ;;  %v421_v0 = vadd.f32 %v550_v61, %v548_v59 }
 0x13d   :  { %v418_v1 = vadd.f32 %v417_v63, %v416_v62 }
 0x140   :  { %v552_v2 = vpop.eup %551 }
 0x141   :  { %v377_v3 = vadd.f32 1.0, %v552_v2 }
 0x143   :  { %553 = vrcp.f32 %v377_v3 }
 0x14d   :  { %v554_v8 = vpop.eup %553 }
 0x14e   :  { %v419_v9 = vmul.f32 %v554_v8, %v415_v7  ;;  %v422_v10 = vadd.f32 %v554_v8, %v421_v0 }
 0x150   :  { %v420_v11 = vadd.f32 %v419_v9, %v418_v1  ;;  %555 = vrcp.f32 %v422_v10 }
 0x15a   :  { %v556_v12 = vpop.eup %555 }
 0x15b   :  { %v424_v13 = vmul.f32 %v556_v12, %v420_v11 }
 0x15d   :  { %426 = vrot.lane.b32.xlu0 %v424_v13, %s657_s2 }
 0x1cf   :  { %v427_v14 = vpop.permute.xlu0 %426 }
 0x1d0   :  { %v429_v15 = vsel %vm235_vm0, %v715_v21, %v427_v14  ;;  %431 = vst.msk [vmem:[#allocation8 + $0x8] sm:$0xff] %vm235_vm0, %v427_v14 }
 0x1d1   :  { %430 = vst [vmem:[#allocation8] sm:$0xff] %v429_v15 }
 0x1d2   :  { %634 = shalt.err (!%p631_p0)
}
 0x1d3   :  { %s635_s26 = scalar_lea.hbm %s740_s3, 256 }
 0x1d4   :  { %p636_p1 = scmp.ne.s32.totalorder %s740_s3, %s635_s26  ;;  %p639_p2 = scmp.lt.u32.totalorder %s635_s26, %s740_s3 }
 0x1d6   :  { %p641_p3 = pnand %p639_p2, %p636_p1 }
 0x1d8   :  { %644 = shalt.err (!%p641_p3)
}
 0x1d9   :  { %441 = dma.vmem_to_hbm [thread:$0]  %s439_s22, 256, %s740_s3, [#allocation4]  }
 0x1da   :  { %649 = dma.done.wait [#allocation4], 256  }
 0x1db   :  { %650 = vsyncadd [#allocation4], 4294967040 }
 0x1dc   :  { %445 = vsyncpa [#allocation3], 1 }
 0x1dd   :  { %446 = vsyncpa [#allocation6], 1 }
 0x1de   :  { %447 = vsyncpa [#allocation4], 1 }

</bundles_post_ra>
